<compile_context>
chip_gen: v7x
topology: tpu7x:2x2x1
jax: 0.10.0
libtpu: 0.0.40
codegen_flags: <defaults>
</compile_context>

<pallas_src>
import math

import numpy as np
import jax
import jax.numpy as jnp
from jax.experimental import pallas as pl
from jax.experimental.pallas import tpu as pltpu


# ---------------- in-kernel math helpers ----------------
def _softplus(x):
    # numerically stable softplus (the chosen output_activation)
    return jnp.maximum(x, 0.0) + jnp.log1p(jnp.exp(-jnp.abs(x)))


_LANCZOS_G = 7.0
_LANCZOS_COEFS = (
    0.99999999999980993,
    676.5203681218851,
    -1259.1392167224028,
    771.32342877765313,
    -176.61502916214059,
    12.507343278686905,
    -0.13857109526572012,
    9.9843695780195716e-6,
    1.5056327351493116e-7,
)


def _lanczos_rational():
    # Restructure c0 + sum_i c_i/(z+i) into a single rational P(z)/Q(z)
    # (coefficients computed once in float64 at import time).
    n = len(_LANCZOS_COEFS) - 1
    q = np.poly1d([1.0])
    for i in range(1, n + 1):
        q = q * np.poly1d([1.0, float(i)])
    p = _LANCZOS_COEFS[0] * q
    for i in range(1, n + 1):
        qi = np.poly1d([1.0])
        for j in range(1, n + 1):
            if j != i:
                qi = qi * np.poly1d([1.0, float(j)])
        p = p + _LANCZOS_COEFS[i] * qi
    return tuple(float(c) for c in p.coeffs), tuple(float(c) for c in q.coeffs)


_LANCZOS_P, _LANCZOS_Q = _lanczos_rational()


def _horner(z, coeffs):
    acc = jnp.full_like(z, coeffs[0])
    for c in coeffs[1:]:
        acc = acc * z + c
    return acc


def _lgamma(z):
    # Lanczos (g=7, n=9) in rational form: ONE reciprocal per element instead
    # of 8 divides.  Valid for z > 0.5; our concentrations are > 2.
    # NOTE: the f32 rational form loses accuracy for very large concentrations
    # (softplus output >> 10); well within 5e-3 tolerance for the ~2..10 range
    # this policy produces.
    zm1 = z - 1.0
    q = _horner(zm1, _LANCZOS_Q)
    r = pl.reciprocal(q, approx=True)      # EUP vrcp — idle slot, ~free
    r = r * (2.0 - q * r)                  # one Newton step: ~full f32 precision
    acc = _horner(zm1, _LANCZOS_P) * r
    t = zm1 + _LANCZOS_G + 0.5
    return (0.5 * math.log(2.0 * math.pi)
            + (zm1 + 0.5) * jnp.log(t) - t + jnp.log(acc))


# ---------------- fused kernel: both heads + log-Beta normalizer ----------------
def _make_fused_kernel(n_layers, act_dim, out_lanes):
    """Output slab layout (lanes): [alpha | beta | lbeta | 0-pad to out_lanes].

    No cross-row (batch) reductions are performed, so ragged last blocks
    (garbage in padded rows) stay row-local and are discarded by the masked
    output store.
    """

    def kernel(*refs):
        x_ref = refs[0]
        out_ref = refs[-1]
        wb = refs[1:-1]            # w0, b0, w1, b1, ..., w_{L-1}, b_{L-1}

        h = x_ref[...]
        for li in range(n_layers):
            w = wb[2 * li][...]
            b = wb[2 * li + 1][...]
            h = jnp.dot(h, w, preferred_element_type=jnp.float32) + b
            if li < n_layers - 1:
                h = jnp.tanh(h)                       # activation

        o = _softplus(h) + 2.0                        # output_activation + add_beta_bias
        ab = o[:, :2 * act_dim]                       # [tile_b, 2*act_dim] = alpha|beta
        alpha = ab[:, :act_dim]
        beta = ab[:, act_dim:]

        # one lane-stacked Lanczos evaluation for all three lgamma terms
        # (lane concat/slices go through the XLU, which is idle here)
        z = jnp.concatenate([ab, alpha + beta], axis=-1)   # [tile_b, 3*act_dim]
        lg = _lgamma(z)
        lbeta = (lg[:, :act_dim] + lg[:, act_dim:2 * act_dim]
                 - lg[:, 2 * act_dim:3 * act_dim])

        pieces = [ab, lbeta]
        pad_w = out_lanes - 3 * act_dim
        if pad_w > 0:
            pieces.append(jnp.zeros((ab.shape[0], pad_w), jnp.float32))
        out_ref[...] = jnp.concatenate(pieces, axis=-1)    # single lane-dense store

    return kernel


# ---------------- parameters (PyTorch nn.Linear style init) ----------------
def beta_policy_params(key, in_features, hidden_sizes, action_dim):
    dims = [in_features] + list(hidden_sizes) + [action_dim]
    n_layers = len(dims) - 1
    keys = jax.random.split(key, 4 * n_layers)
    ki = 0
    params = {}
    for net in ("alpha", "beta"):
        ws, bs = [], []
        for i in range(n_layers):
            fan_in, fan_out = dims[i], dims[i + 1]
            bound = 1.0 / math.sqrt(fan_in)
            w = jax.random.uniform(keys[ki], (fan_in, fan_out), jnp.float32, -bound, bound)
            ki += 1
            b = jax.random.uniform(keys[ki], (1, fan_out), jnp.float32, -bound, bound)
            ki += 1
            ws.append(w)        # stored pre-transposed: [fan_in, fan_out]
            bs.append(b)
        params[net] = (ws, bs)
    return params


# ---------------- one-time weight packing (outside the jitted path) ----------------
def _round_up(x, m):
    return (x + m - 1) // m * m


def _block_diag(a, b):
    top = jnp.concatenate([a, jnp.zeros((a.shape[0], b.shape[1]), a.dtype)], axis=1)
    bot = jnp.concatenate([jnp.zeros((b.shape[0], a.shape[1]), b.dtype), b], axis=1)
    return jnp.concatenate([top, bot], axis=0)


def pack_beta_policy_params(params):
    """Run ONCE at init: fuse the alpha/beta heads into a single matmul chain
    (layer-0 lane-concat, deeper layers block-diagonal) and zero-pad the final
    layer to a lane-dense 128-multiple width.  Returns a flat tuple
    (w0, b0, w1, b1, ...) to be passed to the jitted forward — this keeps the
    concat/zero-pad HBM materializations off the per-call path."""
    (wa, ba), (wbt, bbt) = params["alpha"], params["beta"]
    n_layers = len(wa)
    packed = [jnp.concatenate([wa[0], wbt[0]], axis=1),
              jnp.concatenate([ba[0], bbt[0]], axis=1)]
    for i in range(1, n_layers):
        packed.append(_block_diag(wa[i], wbt[i]))
        packed.append(jnp.concatenate([ba[i], bbt[i]], axis=1))
    w_last, b_last = packed[-2], packed[-1]
    lane_w = max(128, _round_up(w_last.shape[1], 128))
    pad = lane_w - w_last.shape[1]
    if pad > 0:
        packed[-2] = jnp.concatenate(
            [w_last, jnp.zeros((w_last.shape[0], pad), w_last.dtype)], axis=1)
        packed[-1] = jnp.concatenate(
            [b_last, jnp.zeros((1, pad), b_last.dtype)], axis=1)
    return tuple(packed)


# ---------------- wrapper ----------------
def _choose_tiling(B):
    # Minimize batch padding with a 1024-row cap per tile ([1024,128] f32
    # double-buffered is <3 MiB — fine even under v7x's 32 MiB scoped VMEM).
    # For B >= 16 force >= 2 grid steps so the "parallel" axis feeds both of
    # v7x's TensorCores; the extra ~0.35 us step on v5e/v6e is noise.
    max_rows = 1024
    min_tiles = 2 if B >= 16 else 1
    n_tiles = max(min_tiles, pl.cdiv(B, max_rows))
    tile_b = _round_up(pl.cdiv(B, n_tiles), 8)
    grid_b = pl.cdiv(B, tile_b)
    return tile_b, grid_b


def beta_policy_forward(packed, x, a, sample_key, *, act_dim):
    B, in_features = x.shape
    n_layers = len(packed) // 2
    out_lanes = max(128, _round_up(3 * act_dim, 128))

    tile_b, grid_b = _choose_tiling(B)

    def _rep_spec(arr):
        return pl.BlockSpec(arr.shape, lambda i: (0, 0))   # resident across grid

    kernel = _make_fused_kernel(n_layers, act_dim, out_lanes)
    # Ragged last block (if tile_b does not divide B) is handled by Pallas with
    # a masked output store — safe because the kernel is row-local.
    out = pl.pallas_call(
        kernel,
        grid=(grid_b,),
        out_shape=jax.ShapeDtypeStruct((B, out_lanes), jnp.float32),
        in_specs=[pl.BlockSpec((tile_b, in_features), lambda i: (i, 0))]
                 + [_rep_spec(w) for w in packed],
        out_specs=pl.BlockSpec((tile_b, out_lanes), lambda i: (i, 0)),
        compiler_params=pltpu.CompilerParams(
            dimension_semantics=("parallel",)),
    )(x, *packed)

    alpha = out[:, 0 * act_dim:1 * act_dim]
    beta = out[:, 1 * act_dim:2 * act_dim]
    lbeta = out[:, 2 * act_dim:3 * act_dim]

    # TODO(synk): Beta sampling (gamma rejection sampling) has no clean Pallas
    # equivalent on TPU; sample in plain JAX.  The remaining log_prob math is a
    # handful of elementwise ops that XLA fuses with the sampler.
    pi = jax.random.beta(sample_key, alpha, beta).astype(jnp.float32)

    eps = 1e-6  # guard: float32 beta samples can hit exactly 0.0 / 1.0
    pi_safe = jnp.clip(pi, eps, 1.0 - eps)
    logp_pi = jnp.sum((alpha - 1.0) * jnp.log(pi_safe)
                      + (beta - 1.0) * jnp.log1p(-pi_safe) - lbeta, axis=1)
    if a is not None:
        logp = jnp.sum((alpha - 1.0) * jnp.log(a)
                       + (beta - 1.0) * jnp.log1p(-a) - lbeta, axis=1)
    else:
        logp = None

    # torch returns pi.squeeze(); log_prob above uses the full-shape pi so this
    # remains correct even when B == 1 or act_dim == 1.
    return jnp.squeeze(pi), logp, logp_pi


if __name__ == "__main__":
    in_features, hidden_sizes, action_dim = 32, (64, 64), 8
    batch = 8

    key = jax.random.PRNGKey(0)
    pkey, xkey, akey, skey = jax.random.split(key, 4)

    params = beta_policy_params(pkey, in_features, hidden_sizes, action_dim)
    packed = pack_beta_policy_params(params)          # one-time, outside jit
    x = jax.random.normal(xkey, (batch, in_features), jnp.float32)
    # actions must lie in (0, 1) for Beta.log_prob to be finite
    a = jax.random.uniform(akey, (batch, action_dim), jnp.float32, 0.05, 0.95)

    fwd = jax.jit(beta_policy_forward, static_argnames=("act_dim",))
    pi, logp, logp_pi = jax.block_until_ready(
        fwd(packed, x, a, skey, act_dim=action_dim))

    assert pi.shape == (batch, action_dim)
    assert logp.shape == (batch,) and logp_pi.shape == (batch,)
    assert bool(jnp.all(jnp.isfinite(logp))) and bool(jnp.all(jnp.isfinite(logp_pi)))
    assert bool(jnp.all(pi > 0.0)) and bool(jnp.all(pi < 1.0))

    # pure-JAX reference (same math, jax.scipy lgamma); loose f32 tolerance
    def ref_net(ws, bs, xin):
        h = xin
        for w, b in zip(ws[:-1], bs[:-1]):
            h = jnp.tanh(h @ w + b)
        return jax.nn.softplus(h @ ws[-1] + bs[-1]) + 2.0

    from jax.scipy.special import gammaln
    al_r = ref_net(*params["alpha"], x)
    be_r = ref_net(*params["beta"], x)
    lbeta_r = gammaln(al_r) + gammaln(be_r) - gammaln(al_r + be_r)
    pi_full = pi.reshape(batch, action_dim)
    pi_safe = jnp.clip(pi_full, 1e-6, 1.0 - 1e-6)
    logp_pi_r = jnp.sum((al_r - 1.0) * jnp.log(pi_safe)
                        + (be_r - 1.0) * jnp.log1p(-pi_safe) - lbeta_r, axis=1)
    logp_r = jnp.sum((al_r - 1.0) * jnp.log(a)
                     + (be_r - 1.0) * jnp.log1p(-a) - lbeta_r, axis=1)

    assert bool(jnp.allclose(logp, logp_r, atol=5e-3, rtol=5e-3))
    assert bool(jnp.allclose(logp_pi, logp_pi_r, atol=5e-3, rtol=5e-3))

    print("KERNEL_OK")
</pallas_src>

<mosaic_0001>
module attributes {stable_mosaic.version = 11 : i64} {
  func.func @kernel(%arg0: i32, %arg1: memref<8x32xf32, #tpu.memory_space<vmem>>, %arg2: memref<32x128xf32, #tpu.memory_space<vmem>>, %arg3: memref<1x128xf32, #tpu.memory_space<vmem>>, %arg4: memref<128x128xf32, #tpu.memory_space<vmem>>, %arg5: memref<1x128xf32, #tpu.memory_space<vmem>>, %arg6: memref<128x128xf32, #tpu.memory_space<vmem>>, %arg7: memref<1x128xf32, #tpu.memory_space<vmem>>, %arg8: memref<8x128xf32, #tpu.memory_space<vmem>>) attributes {dimension_semantics = [#tpu.dimension_semantics<parallel>], iteration_bounds = array<i64: 1>, scalar_prefetch = 0 : i64, scratch_operands = 0 : i64, tpu.core_type = #tpu.core_type<tc>, window_params = [{transform_indices = @transform_0, window_bounds = array<i64: 8, 32>}, {pipeline_mode = #tpu.pipeline_mode<synchronous>, transform_indices = @transform_1, window_bounds = array<i64: 32, 128>}, {pipeline_mode = #tpu.pipeline_mode<synchronous>, transform_indices = @transform_2, window_bounds = array<i64: 1, 128>}, {pipeline_mode = #tpu.pipeline_mode<synchronous>, transform_indices = @transform_3, window_bounds = array<i64: 128, 128>}, {pipeline_mode = #tpu.pipeline_mode<synchronous>, transform_indices = @transform_4, window_bounds = array<i64: 1, 128>}, {pipeline_mode = #tpu.pipeline_mode<synchronous>, transform_indices = @transform_5, window_bounds = array<i64: 128, 128>}, {pipeline_mode = #tpu.pipeline_mode<synchronous>, transform_indices = @transform_6, window_bounds = array<i64: 1, 128>}, {transform_indices = @transform_7, window_bounds = array<i64: 8, 128>}]} {
    %c0 = arith.constant 0 : index
    %c0_0 = arith.constant 0 : index
    %0 = vector.load %arg1[%c0, %c0_0] : memref<8x32xf32, #tpu.memory_space<vmem>>, vector<8x32xf32>
    %c0_1 = arith.constant 0 : index
    %c0_2 = arith.constant 0 : index
    %1 = vector.load %arg2[%c0_1, %c0_2] : memref<32x128xf32, #tpu.memory_space<vmem>>, vector<32x128xf32>
    %c0_3 = arith.constant 0 : index
    %c0_4 = arith.constant 0 : index
    %2 = vector.load %arg3[%c0_3, %c0_4] : memref<1x128xf32, #tpu.memory_space<vmem>>, vector<1x128xf32>
    %cst = arith.constant dense<0.000000e+00> : vector<8x128xf32>
    %3 = tpu.matmul %0, %1, %cst {dimension_numbers = #tpu.dot_dimension_numbers<[1], [0], [0], [1], [0, 0, 1, 1], [], []>} : vector<8x32xf32>, vector<32x128xf32>, vector<8x128xf32> -> vector<8x128xf32>
    %4 = vector.broadcast %2 : vector<1x128xf32> to vector<8x128xf32>
    %5 = arith.addf %3, %4 : vector<8x128xf32>
    %6 = math.tanh %5 : vector<8x128xf32>
    %c0_5 = arith.constant 0 : index
    %c0_6 = arith.constant 0 : index
    %7 = vector.load %arg4[%c0_5, %c0_6] : memref<128x128xf32, #tpu.memory_space<vmem>>, vector<128x128xf32>
    %c0_7 = arith.constant 0 : index
    %c0_8 = arith.constant 0 : index
    %8 = vector.load %arg5[%c0_7, %c0_8] : memref<1x128xf32, #tpu.memory_space<vmem>>, vector<1x128xf32>
    %cst_9 = arith.constant dense<0.000000e+00> : vector<8x128xf32>
    %9 = tpu.matmul %6, %7, %cst_9 {dimension_numbers = #tpu.dot_dimension_numbers<[1], [0], [0], [1], [0, 0, 1, 1], [], []>} : vector<8x128xf32>, vector<128x128xf32>, vector<8x128xf32> -> vector<8x128xf32>
    %10 = vector.broadcast %8 : vector<1x128xf32> to vector<8x128xf32>
    %11 = arith.addf %9, %10 : vector<8x128xf32>
    %12 = math.tanh %11 : vector<8x128xf32>
    %c0_10 = arith.constant 0 : index
    %c0_11 = arith.constant 0 : index
    %13 = vector.load %arg6[%c0_10, %c0_11] : memref<128x128xf32, #tpu.memory_space<vmem>>, vector<128x128xf32>
    %c0_12 = arith.constant 0 : index
    %c0_13 = arith.constant 0 : index
    %14 = vector.load %arg7[%c0_12, %c0_13] : memref<1x128xf32, #tpu.memory_space<vmem>>, vector<1x128xf32>
    %cst_14 = arith.constant dense<0.000000e+00> : vector<8x128xf32>
    %15 = tpu.matmul %12, %13, %cst_14 {dimension_numbers = #tpu.dot_dimension_numbers<[1], [0], [0], [1], [0, 0, 1, 1], [], []>} : vector<8x128xf32>, vector<128x128xf32>, vector<8x128xf32> -> vector<8x128xf32>
    %16 = vector.broadcast %14 : vector<1x128xf32> to vector<8x128xf32>
    %17 = arith.addf %15, %16 : vector<8x128xf32>
    %cst_15 = arith.constant 0.000000e+00 : f32
    %18 = vector.broadcast %cst_15 : f32 to vector<8x128xf32>
    %19 = arith.maximumf %17, %18 : vector<8x128xf32>
    %20 = math.absf %17 : vector<8x128xf32>
    %cst_16 = arith.constant 0.000000e+00 : f32
    %21 = vector.broadcast %cst_16 : f32 to vector<8x128xf32>
    %22 = arith.subf %21, %20 : vector<8x128xf32>
    %23 = math.exp %22 : vector<8x128xf32>
    %24 = math.log1p %23 : vector<8x128xf32>
    %25 = arith.addf %19, %24 : vector<8x128xf32>
    %cst_17 = arith.constant 2.000000e+00 : f32
    %26 = vector.broadcast %cst_17 : f32 to vector<8x128xf32>
    %27 = arith.addf %25, %26 : vector<8x128xf32>
    %28 = vector.extract_strided_slice %27 {offsets = [0, 0], sizes = [8, 16], strides = [1, 1]} : vector<8x128xf32> to vector<8x16xf32>
    %29 = vector.extract_strided_slice %28 {offsets = [0, 0], sizes = [8, 8], strides = [1, 1]} : vector<8x16xf32> to vector<8x8xf32>
    %30 = vector.extract_strided_slice %28 {offsets = [0, 8], sizes = [8, 8], strides = [1, 1]} : vector<8x16xf32> to vector<8x8xf32>
    %31 = arith.addf %29, %30 : vector<8x8xf32>
    %32 = tpu.concatenate %28, %31 in 1 : vector<8x16xf32>, vector<8x8xf32> -> vector<8x24xf32>
    %cst_18 = arith.constant 1.000000e+00 : f32
    %33 = vector.broadcast %cst_18 : f32 to vector<8x24xf32>
    %34 = arith.subf %32, %33 : vector<8x24xf32>
    %cst_19 = arith.constant 1.000000e+00 : f32
    %35 = vector.broadcast %cst_19 : f32 to vector<8x24xf32>
    %36 = arith.mulf %35, %34 : vector<8x24xf32>
    %cst_20 = arith.constant 3.600000e+01 : f32
    %37 = vector.broadcast %cst_20 : f32 to vector<8x24xf32>
    %38 = arith.addf %36, %37 : vector<8x24xf32>
    %39 = arith.mulf %38, %34 : vector<8x24xf32>
    %cst_21 = arith.constant 5.460000e+02 : f32
    %40 = vector.broadcast %cst_21 : f32 to vector<8x24xf32>
    %41 = arith.addf %39, %40 : vector<8x24xf32>
    %42 = arith.mulf %41, %34 : vector<8x24xf32>
    %cst_22 = arith.constant 4.536000e+03 : f32
    %43 = vector.broadcast %cst_22 : f32 to vector<8x24xf32>
    %44 = arith.addf %42, %43 : vector<8x24xf32>
    %45 = arith.mulf %44, %34 : vector<8x24xf32>
    %cst_23 = arith.constant 2.244900e+04 : f32
    %46 = vector.broadcast %cst_23 : f32 to vector<8x24xf32>
    %47 = arith.addf %45, %46 : vector<8x24xf32>
    %48 = arith.mulf %47, %34 : vector<8x24xf32>
    %cst_24 = arith.constant 6.728400e+04 : f32
    %49 = vector.broadcast %cst_24 : f32 to vector<8x24xf32>
    %50 = arith.addf %48, %49 : vector<8x24xf32>
    %51 = arith.mulf %50, %34 : vector<8x24xf32>
    %cst_25 = arith.constant 1.181240e+05 : f32
    %52 = vector.broadcast %cst_25 : f32 to vector<8x24xf32>
    %53 = arith.addf %51, %52 : vector<8x24xf32>
    %54 = arith.mulf %53, %34 : vector<8x24xf32>
    %cst_26 = arith.constant 1.095840e+05 : f32
    %55 = vector.broadcast %cst_26 : f32 to vector<8x24xf32>
    %56 = arith.addf %54, %55 : vector<8x24xf32>
    %57 = arith.mulf %56, %34 : vector<8x24xf32>
    %cst_27 = arith.constant 4.032000e+04 : f32
    %58 = vector.broadcast %cst_27 : f32 to vector<8x24xf32>
    %59 = arith.addf %57, %58 : vector<8x24xf32>
    %60 = tpu.reciprocal %59 {approx = true} : vector<8x24xf32> -> vector<8x24xf32>
    %61 = arith.mulf %59, %60 : vector<8x24xf32>
    %cst_28 = arith.constant 2.000000e+00 : f32
    %62 = vector.broadcast %cst_28 : f32 to vector<8x24xf32>
    %63 = arith.subf %62, %61 : vector<8x24xf32>
    %64 = arith.mulf %60, %63 : vector<8x24xf32>
    %cst_29 = arith.constant 1.000000e+00 : f32
    %65 = vector.broadcast %cst_29 : f32 to vector<8x24xf32>
    %66 = arith.mulf %65, %34 : vector<8x24xf32>
    %cst_30 = arith.constant 60.4583321 : f32
    %67 = vector.broadcast %cst_30 : f32 to vector<8x24xf32>
    %68 = arith.addf %66, %67 : vector<8x24xf32>
    %69 = arith.mulf %68, %34 : vector<8x24xf32>
    %cst_31 = arith.constant 1599.04248 : f32
    %70 = vector.broadcast %cst_31 : f32 to vector<8x24xf32>
    %71 = arith.addf %69, %70 : vector<8x24xf32>
    %72 = arith.mulf %71, %34 : vector<8x24xf32>
    %cst_32 = arith.constant 24165.5098 : f32
    %73 = vector.broadcast %cst_32 : f32 to vector<8x24xf32>
    %74 = arith.addf %72, %73 : vector<8x24xf32>
    %75 = arith.mulf %74, %34 : vector<8x24xf32>
    %cst_33 = arith.constant 228235.219 : f32
    %76 = vector.broadcast %cst_33 : f32 to vector<8x24xf32>
    %77 = arith.addf %75, %76 : vector<8x24xf32>
    %78 = arith.mulf %77, %34 : vector<8x24xf32>
    %cst_34 = arith.constant 1379496.25 : f32
    %79 = vector.broadcast %cst_34 : f32 to vector<8x24xf32>
    %80 = arith.addf %78, %79 : vector<8x24xf32>
    %81 = arith.mulf %80, %34 : vector<8x24xf32>
    %cst_35 = arith.constant 0x4A9F05EA : f32
    %82 = vector.broadcast %cst_35 : f32 to vector<8x24xf32>
    %83 = arith.addf %81, %82 : vector<8x24xf32>
    %84 = arith.mulf %83, %34 : vector<8x24xf32>
    %cst_36 = arith.constant 0x4B2B9D51 : f32
    %85 = vector.broadcast %cst_36 : f32 to vector<8x24xf32>
    %86 = arith.addf %84, %85 : vector<8x24xf32>
    %87 = arith.mulf %86, %34 : vector<8x24xf32>
    %cst_37 = arith.constant 0x4B220ADA : f32
    %88 = vector.broadcast %cst_37 : f32 to vector<8x24xf32>
    %89 = arith.addf %87, %88 : vector<8x24xf32>
    %90 = arith.mulf %89, %64 : vector<8x24xf32>
    %cst_38 = arith.constant 7.000000e+00 : f32
    %91 = vector.broadcast %cst_38 : f32 to vector<8x24xf32>
    %92 = arith.addf %34, %91 : vector<8x24xf32>
    %cst_39 = arith.constant 5.000000e-01 : f32
    %93 = vector.broadcast %cst_39 : f32 to vector<8x24xf32>
    %94 = arith.addf %92, %93 : vector<8x24xf32>
    %cst_40 = arith.constant 5.000000e-01 : f32
    %95 = vector.broadcast %cst_40 : f32 to vector<8x24xf32>
    %96 = arith.addf %34, %95 : vector<8x24xf32>
    %97 = math.log %94 : vector<8x24xf32>
    %98 = arith.mulf %96, %97 : vector<8x24xf32>
    %cst_41 = arith.constant 0.918938517 : f32
    %99 = vector.broadcast %cst_41 : f32 to vector<8x24xf32>
    %100 = arith.addf %99, %98 : vector<8x24xf32>
    %101 = arith.subf %100, %94 : vector<8x24xf32>
    %102 = math.log %90 : vector<8x24xf32>
    %103 = arith.addf %101, %102 : vector<8x24xf32>
    %104 = vector.extract_strided_slice %103 {offsets = [0, 0], sizes = [8, 8], strides = [1, 1]} : vector<8x24xf32> to vector<8x8xf32>
    %105 = vector.extract_strided_slice %103 {offsets = [0, 8], sizes = [8, 8], strides = [1, 1]} : vector<8x24xf32> to vector<8x8xf32>
    %106 = arith.addf %104, %105 : vector<8x8xf32>
    %107 = vector.extract_strided_slice %103 {offsets = [0, 16], sizes = [8, 8], strides = [1, 1]} : vector<8x24xf32> to vector<8x8xf32>
    %108 = arith.subf %106, %107 : vector<8x8xf32>
    %cst_42 = arith.constant 0.000000e+00 : f32
    %109 = vector.broadcast %cst_42 : f32 to vector<8x104xf32>
    %110 = tpu.concatenate %28, %108, %109 in 1 : vector<8x16xf32>, vector<8x8xf32>, vector<8x104xf32> -> vector<8x128xf32>
    %c0_43 = arith.constant 0 : index
    %c0_44 = arith.constant 0 : index
    %111 = vector.load %arg8[%c0_43, %c0_44] : memref<8x128xf32, #tpu.memory_space<vmem>>, vector<8x128xf32>
    tpu.vector_store %arg8[%c0_43, %c0_44], %110 {strides = array<i32>} : memref<8x128xf32, #tpu.memory_space<vmem>>, vector<8x128xf32>,
    return
  }
  func.func @transform_0(%arg0: i32) -> (i32, i32) {
    %c0_i32 = arith.constant 0 : i32
    %c0_i32_0 = arith.constant 0 : i32
    return %arg0, %c0_i32 : i32, i32
  }
  func.func @transform_1(%arg0: i32) -> (i32, i32) {
    %c0_i32 = arith.constant 0 : i32
    %c0_i32_0 = arith.constant 0 : i32
    %c0_i32_1 = arith.constant 0 : i32
    return %c0_i32, %c0_i32_0 : i32, i32
  }
  func.func @transform_2(%arg0: i32) -> (i32, i32) {
    %c0_i32 = arith.constant 0 : i32
    %c0_i32_0 = arith.constant 0 : i32
    %c0_i32_1 = arith.constant 0 : i32
    return %c0_i32, %c0_i32_0 : i32, i32
  }
  func.func @transform_3(%arg0: i32) -> (i32, i32) {
    %c0_i32 = arith.constant 0 : i32
    %c0_i32_0 = arith.constant 0 : i32
    %c0_i32_1 = arith.constant 0 : i32
    return %c0_i32, %c0_i32_0 : i32, i32
  }
  func.func @transform_4(%arg0: i32) -> (i32, i32) {
    %c0_i32 = arith.constant 0 : i32
    %c0_i32_0 = arith.constant 0 : i32
    %c0_i32_1 = arith.constant 0 : i32
    return %c0_i32, %c0_i32_0 : i32, i32
  }
  func.func @transform_5(%arg0: i32) -> (i32, i32) {
    %c0_i32 = arith.constant 0 : i32
    %c0_i32_0 = arith.constant 0 : i32
    %c0_i32_1 = arith.constant 0 : i32
    return %c0_i32, %c0_i32_0 : i32, i32
  }
  func.func @transform_6(%arg0: i32) -> (i32, i32) {
    %c0_i32 = arith.constant 0 : i32
    %c0_i32_0 = arith.constant 0 : i32
    %c0_i32_1 = arith.constant 0 : i32
    return %c0_i32, %c0_i32_0 : i32, i32
  }
  func.func @transform_7(%arg0: i32) -> (i32, i32) {
    %c0_i32 = arith.constant 0 : i32
    %c0_i32_0 = arith.constant 0 : i32
    return %arg0, %c0_i32 : i32, i32
  }
}

</mosaic_0001>

<bundles_post_ra>
// kernel: beta_policy_forward.3
= control target key start
LH: loop header
LB: loop body
LE: loop exit
PB: predicated region body
PF: predicated region fallthrough
CT: control target
= control target key end

     0   :  { %12 = vsyncpa [#allocation3], 0  ;;  %s933_s0 = inlined_call_operand.hbm [shape: f32[8,32], index: 0, kind: input, shape index: {}]   ;;  %s934_s1 = inlined_call_operand.hbm [shape: f32[32,128], index: 1, kind: input, shape index: {}]   ;;  %s935_s2 = inlined_call_operand.vmem [shape: f32[1,128], index: 2, kind: input, shape index: {}]   ;;  %s936_s3 = inlined_call_operand.vmem [shape: f32[128,128], index: 3, kind: input, shape index: {}]   ;;  %s937_s4 = inlined_call_operand.hbm [shape: f32[1,128], index: 4, kind: input, shape index: {}]   ;;  %s938_s5 = inlined_call_operand.vmem [shape: f32[128,128], index: 5, kind: input, shape index: {}]   ;;  %s939_s6 = inlined_call_operand.vmem [shape: f32[1,128], index: 6, kind: input, shape index: {}]   ;;  %s940_s7 = inlined_call_operand.vmem [shape: f32[8,128], index: 7, kind: output, shape index: {}]  }
   0x1   :  { %13 = vsyncpa [#allocation5], 0  ;;  %s708_s24 = smov [#allocation4]   ;;  %s638_s28 = scalar_lea.hbm %s934_s1, 512 }
   0x2   :  { %s29_s25 = sshll.u32 %s708_s24, 4  ;;  %p639_p0 = scmp.ne.s32.totalorder %s934_s1, %s638_s28  ;;  %s30_s25 = int_to_ptr.vmem [resolvable:$true] %s29_s25 }
   0x3   :  { %p642_p1 = scmp.lt.u32.totalorder %s638_s28, %s934_s1 }
   0x5   :  { %p644_p2 = pnand %p642_p1, %p639_p0 }
   0x7   :  { %647 = shalt.err (!%p644_p2)
}
   0x8   :  { %s648_s10 = scalar_lea.vmem %s30_s25, 512  ;;  %p653_p4 = scmp.lt.s32.totalorder %s30_s25, %s30_s25 }
   0x9   :  { %p649_p3 = scmp.ne.s32.totalorder %s30_s25, %s648_s10  ;;  %p654_p5 = scmp.lt.s32.totalorder %s648_s10, %s648_s10 }
   0xb   :  { %p655_p6 = por %p654_p5, %p653_p4 }
   0xd   :  { %p656_p7 = pnand %p655_p6, %p649_p3 }
   0xf   :  { %659 = shalt.err (!%p656_p7)
}
  0x10   :  { %s709_s11 = smov 128   ;;  %s710_s12 = smov 8  }
  0x11   :  { %35 = dma.hbm_to_vmem [thread:$0]  %s934_s1, 512, %s30_s25, [#allocation5], %s709_s11, %s709_s11, %s710_s12  }
  0x12   :  { %s711_s15 = smov [#allocation2]   ;;  %s712_s17 = smov [#allocation6]  }
  0x13   :  { %s20_s16 = sshll.u32 %s711_s15, 4  ;;  %s46_s18 = sshll.u32 %s712_s17, 4  ;;  %s21_s16 = int_to_ptr.vmem [resolvable:$true] %s20_s16  ;;  %s47_s18 = int_to_ptr.vmem [resolvable:$true] %s46_s18 }
  0x14   :  { %s660_s21 = scalar_lea.hbm %s933_s0, 128 }
  0x15   :  { %p661_p8 = scmp.ne.s32.totalorder %s933_s0, %s660_s21  ;;  %p664_p9 = scmp.lt.u32.totalorder %s660_s21, %s933_s0 }
  0x17   :  { %p666_p10 = pnand %p664_p9, %p661_p8 }
  0x19   :  { %669 = shalt.err (!%p666_p10)
}
  0x1a   :  { %s670_s1 = scalar_lea.vmem %s21_s16, 128  ;;  %p675_p12 = scmp.lt.s32.totalorder %s21_s16, %s21_s16 }
  0x1b   :  { %p671_p11 = scmp.ne.s32.totalorder %s21_s16, %s670_s1  ;;  %p676_p13 = scmp.lt.s32.totalorder %s670_s1, %s670_s1 }
  0x1d   :  { %p677_p0 = por %p676_p13, %p675_p12 }
  0x1f   :  { %p678_p1 = pnand %p677_p0, %p671_p11 }
  0x21   :  { %681 = shalt.err (!%p678_p1)
}
  0x22   :  { %23 = dma.hbm_to_vmem [thread:$0]  %s933_s0, 128, %s21_s16, [#allocation3]  }
  0x23   :  { %s682_s30 = scalar_lea.hbm %s937_s4, 16 }
  0x24   :  { %p683_p2 = scmp.ne.s32.totalorder %s937_s4, %s682_s30  ;;  %p686_p3 = scmp.lt.u32.totalorder %s682_s30, %s937_s4 }
  0x26   :  { %p688_p4 = pnand %p686_p3, %p683_p2 }
  0x28   :  { %691 = shalt.err (!%p688_p4)
}
  0x29   :  { %s692_s12 = scalar_lea.vmem %s47_s18, 16  ;;  %s696_s13 = scalar_lea.vmem %s47_s18, 32 }
  0x2a   :  { %p693_p5 = scmp.ne.s32.totalorder %s47_s18, %s692_s12  ;;  %p697_p6 = scmp.lt.s32.totalorder %s47_s18, %s47_s18 }
  0x2b   :  { %p698_p7 = scmp.lt.s32.totalorder %s696_s13, %s692_s12 }
  0x2d   :  { %p699_p8 = por %p698_p7, %p697_p6 }
  0x2f   :  { %p700_p9 = pnand %p699_p8, %p693_p5 }
  0x31   :  { %703 = shalt.err (!%p700_p9)
}
  0x32   :  { %49 = dma.hbm_to_vmem [thread:$0]  %s937_s4, 16, %s47_s18, [#allocation5]  }
  0x33   :  { %704 = dma.done.wait [#allocation3], 128  }
  0x34   :  { %705 = vsyncadd [#allocation3], 4294967168 }
  0x35   :  { %706 = dma.done.wait [#allocation5], 528  }
  0x36   :  { %707 = vsyncadd [#allocation5], 4294966768  ;;  %v713_v0 = vmov 0.0|0.0   ;;  %vm714_vm0 = vmmov 0   ;;  %v715_v1 = vmov 0.0   ;;  %v64_v2 = vld [vmem:[#allocation4] sm:$0xff] }
  0x37   :  { %559 = vmatprep.subr.bf16.mxu0 %v713_v0  ;;  %486 = vmatprep.mubr.msk.f32.mxu0 %vm714_vm0, %v715_v1  ;;  %v65_v3 = vld [vmem:[#allocation4 + $0x8] sm:$0xff]  ;;  %v66_v4 = vld [vmem:[#allocation4 + $0x10] sm:$0xff]  ;;  %v67_v6 = vld [vmem:[#allocation4 + $0x18] sm:$0xff]  ;;  %vm75_vm1 = vcmask 261120   ;;  %vm362_vm3 = vcmask 130048   ;;  %s718_s25 = smov 112  }
  0x38   :  { %565 = vmatprep.subr.bf16.mxu1 %v713_v0  ;;  %521 = vmatprep.mubr.msk.f32.mxu1 %vm714_vm0, %v715_v1  ;;  %v560_v5 = vpack.c.bf16 %v65_v3, %v64_v2  ;;  %v150_v7 = vld [vmem:[%s936_s3] sm:$0xff]  ;;  %v151_v8 = vld [vmem:[%s936_s3 + $0x8] sm:$0xff]  ;;  %v152_v9 = vld [vmem:[%s936_s3 + $0x10] sm:$0xff]  ;;  %v563_v11 = vpack.c.bf16 %v67_v6, %v66_v4  ;;  %vm425_vm4 = vcmask 195584  }
  0x39   :  { %v153_v10 = vld [vmem:[%s936_s3 + $0x18] sm:$0xff]  ;;  %v566_v12 = vpack.c.bf16 %v151_v8, %v150_v7  ;;  %v154_v14 = vld [vmem:[%s936_s3 + $0x20] sm:$0xff]  ;;  %v155_v15 = vld [vmem:[%s936_s3 + $0x28] sm:$0xff] }
  0x3a   :  { %561 = vmatpush3.bf16.msra.mxu0 %v560_v5  ;;  %v569_v13 = vpack.c.bf16 %v153_v10, %v152_v9  ;;  %v63_v16 = vld [vmem:[#allocation2] sm:$0xff]  ;;  %v572_v17 = vpack.c.bf16 %v155_v15, %v154_v14  ;;  %v156_v18 = vld [vmem:[%s936_s3 + $0x30] sm:$0xff]  ;;  %v157_v19 = vld [vmem:[%s936_s3 + $0x38] sm:$0xff] }
  0x3b   :  { %562 = vmatprep.subr.bf16.mxu0 %v713_v0  ;;  %567 = vmatpush3.bf16.msra.mxu1 %v566_v12  ;;  %v575_v20 = vpack.c.bf16 %v157_v19, %v156_v18  ;;  %v158_v21 = vld [vmem:[%s936_s3 + $0x40] sm:$0xff]  ;;  %v159_v22 = vld [vmem:[%s936_s3 + $0x48] sm:$0xff]  ;;  %v160_v24 = vld [vmem:[%s936_s3 + $0x50] sm:$0xff] }
  0x3c   :  { %568 = vmatprep.subr.bf16.mxu1 %v713_v0  ;;  %v578_v23 = vpack.c.bf16 %v159_v22, %v158_v21  ;;  %v161_v25 = vld [vmem:[%s936_s3 + $0x58] sm:$0xff]  ;;  %v162_v27 = vld [vmem:[%s936_s3 + $0x60] sm:$0xff]  ;;  %v163_v28 = vld [vmem:[%s936_s3 + $0x68] sm:$0xff] }
  0x3d   :  { %v581_v26 = vpack.c.bf16 %v161_v25, %v160_v24  ;;  %v584_v29 = vpack.c.bf16 %v163_v28, %v162_v27  ;;  %v164_v30 = vld [vmem:[%s936_s3 + $0x70] sm:$0xff]  ;;  %v165_v31 = vld [vmem:[%s936_s3 + $0x78] sm:$0xff]  ;;  %v244_v33 = vld [vmem:[%s938_s5] sm:$0xff] }
  0x3e   :  { %564 = vmatpush3.bf16.msra.mxu0 %v563_v11  ;;  %v587_v32 = vpack.c.bf16 %v165_v31, %v164_v30  ;;  %v245_v34 = vld [vmem:[%s938_s5 + $0x8] sm:$0xff]  ;;  %v246_v35 = vld [vmem:[%s938_s5 + $0x10] sm:$0xff]  ;;  %v247_v37 = vld [vmem:[%s938_s5 + $0x18] sm:$0xff] }
  0x3f   :  { %589 = vmatprep.subr.bf16.mxu0 %v713_v0  ;;  %570 = vmatpush3.bf16.msra.mxu1 %v569_v13  ;;  %v590_v36 = vpack.c.bf16 %v245_v34, %v244_v33  ;;  %v593_v38 = vpack.c.bf16 %v247_v37, %v246_v35  ;;  %v248_v39 = vld [vmem:[%s938_s5 + $0x20] sm:$0xff]  ;;  %v249_v40 = vld [vmem:[%s938_s5 + $0x28] sm:$0xff]  ;;  %v250_v42 = vld [vmem:[%s938_s5 + $0x30] sm:$0xff] }
  0x40   :  { %571 = vmatprep.subr.bf16.mxu1 %v713_v0  ;;  %v596_v41 = vpack.c.bf16 %v249_v40, %v248_v39  ;;  %v251_v43 = vld [vmem:[%s938_s5 + $0x38] sm:$0xff]  ;;  %v252_v45 = vld [vmem:[%s938_s5 + $0x40] sm:$0xff]  ;;  %v253_v46 = vld [vmem:[%s938_s5 + $0x48] sm:$0xff] }
  0x41   :  { %487 = vmatmul.mubr.msk.f32.vlgmr.msra.gmra.mrb[0].mxu0 %vm75_vm1, %v63_v16  ;;  %v599_v44 = vpack.c.bf16 %v251_v43, %v250_v42  ;;  %v602_v47 = vpack.c.bf16 %v253_v46, %v252_v45  ;;  %v434_v48 = vld [vmem:[%s935_s2] ss:$0 sm:$0xff]  ;;  %v254_v53 = vld [vmem:[%s938_s5 + $0x50] sm:$0xff]  ;;  %v255_v54 = vld [vmem:[%s938_s5 + $0x58] sm:$0xff] }
  0x42   :  { %556 = vmatprep.mubr.msk.f32.mxu0 %vm714_vm0, %v715_v1  ;;  %591 = vmatpush3.bf16.msra.mxu0 %v590_v36  ;;  %v605_v55 = vpack.c.bf16 %v255_v54, %v254_v53  ;;  %v256_v56 = vld [vmem:[%s938_s5 + $0x60] sm:$0xff]  ;;  %v257_v57 = vld [vmem:[%s938_s5 + $0x68] sm:$0xff]  ;;  %v258_v59 = vld [vmem:[%s938_s5 + $0x70] sm:$0xff] }
  0x43   :  { %573 = vmatpush3.bf16.msra.mxu1 %v572_v17  ;;  %592 = vmatprep.subr.bf16.mxu0 %v713_v0  ;;  %v608_v58 = vpack.c.bf16 %v257_v57, %v256_v56  ;;  %v259_v60 = vld [vmem:[%s938_s5 + $0x78] sm:$0xff]  ;;  %v436_v62 = vld [vmem:[#allocation6] ss:$0 sm:$0xff]  ;;  %v437_v4 = vld [vmem:[%s939_s6] ss:$0 sm:$0xff]  ;;  %s716_s5 = smov 120  }
  0x44   :  { %574 = vmatprep.subr.bf16.mxu1 %v713_v0  ;;  %v611_v61 = vpack.c.bf16 %v259_v60, %v258_v59  ;;  %s717_s6 = smov 16  }
  0x46   :  { %594 = vmatpush3.bf16.msra.mxu0 %v593_v38 }
  0x47   :  { %576 = vmatpush3.bf16.msra.mxu1 %v575_v20  ;;  %595 = vmatprep.subr.bf16.mxu0 %v713_v0 }
  0x48   :  { %577 = vmatprep.subr.bf16.mxu1 %v713_v0 }
  0x4a   :  { %597 = vmatpush3.bf16.msra.mxu0 %v596_v41 }
  0x4b   :  { %579 = vmatpush3.bf16.msra.mxu1 %v578_v23  ;;  %598 = vmatprep.subr.bf16.mxu0 %v713_v0 }
  0x4c   :  { %580 = vmatprep.subr.bf16.mxu1 %v713_v0 }
  0x4e   :  { %600 = vmatpush3.bf16.msra.mxu0 %v599_v44 }
  0x4f   :  { %582 = vmatpush3.bf16.msra.mxu1 %v581_v26  ;;  %601 = vmatprep.subr.bf16.mxu0 %v713_v0 }
  0x50   :  { %583 = vmatprep.subr.bf16.mxu1 %v713_v0 }
  0x52   :  { %603 = vmatpush3.bf16.msra.mxu0 %v602_v47 }
  0x53   :  { %585 = vmatpush3.bf16.msra.mxu1 %v584_v29  ;;  %604 = vmatprep.subr.bf16.mxu0 %v713_v0 }
  0x54   :  { %586 = vmatprep.subr.bf16.mxu1 %v713_v0 }
  0x56   :  { %606 = vmatpush3.bf16.msra.mxu0 %v605_v55 }
  0x57   :  { %588 = vmatpush3.bf16.msra.mxu1 %v587_v32  ;;  %607 = vmatprep.subr.bf16.mxu0 %v713_v0 }
  0x5a   :  { %609 = vmatpush3.bf16.msra.mxu0 %v608_v58 }
  0x5b   :  { %610 = vmatprep.subr.bf16.mxu0 %v713_v0 }
  0x5e   :  { %612 = vmatpush3.bf16.msra.mxu0 %v611_v61 }
 0x114   :  { %v145_v49 = vpop.f32.mrb[0].mxu0 }
 0x115   :  { %v146_v50 = vadd.f32 %v434_v48, %v145_v49  ;;  %v488_v51 = vpop.f32.mrb[1].mxu0 }
 0x117   :  { %624 = vtanh.f32 %v146_v50 }
 0x121   :  { %v625_v52 = vpop.eup %624 }
 0x122   :  { %522 = vmatmul.mubr.f32.vlgmr.msra.gmra.mrb[0].mxu1 %v625_v52 }
 0x1f5   :  { %v239_v63 = vpop.f32.mrb[0].mxu1 }
 0x1f6   :  { %v240_v1 = vadd.f32 %v436_v62, %v239_v63  ;;  %v523_v2 = vpop.f32.mrb[1].mxu1 }
 0x1f8   :  { %626 = vtanh.f32 %v240_v1 }
 0x202   :  { %v627_v3 = vpop.eup %626 }
 0x203   :  { %557 = vmatmul.mubr.f32.vlgmr.msra.gmra.mrb[2].mxu0 %v627_v3 }
 0x2d6   :  { %v333_v5 = vpop.f32.mrb[2].mxu0 }
 0x2d7   :  { %v334_v6 = vadd.f32 %v437_v4, %v333_v5  ;;  %v558_v7 = vpop.f32.mrb[3].mxu0 }
 0x2d9   :  { %v338_v8 = vand.u32 2147483647, %v334_v6  ;;  %v337_v18 = vmax.f32 %v334_v6, 0.0 }
 0x2db   :  { %v339_v9 = vsub.f32 0.0, %v338_v8 }
 0x2dd   :  { %v340_v10 = vmul.f32 1.442695, %v339_v9 }
 0x2df   :  { %628 = vpow2.f32 %v340_v10 }
 0x2e9   :  { %v629_v0 = vpop.eup %628 }
 0x2ea   :  { %v342_v11 = vadd.f32 1.0, %v629_v0  ;;  %v345_v12 = vmul.f32 -0.5, %v629_v0  ;;  %v348_v14 = vand.u32 2147483647, %v629_v0 }
 0x2ec   :  { %630 = vlog2.f32 %v342_v11  ;;  %v346_v13 = vadd.f32 1.0, %v345_v12  ;;  %vm349_vm2 = vcmp.lt.f32.partialorder %v348_v14, 0.0004427343 }
 0x2ee   :  { %v347_v17 = vmul.f32 %v629_v0, %v346_v13 }
 0x2f6   :  { %v631_v15 = vpop.eup %630 }
 0x2f7   :  { %v344_v16 = vmul.f32 0.6931472, %v631_v15 }
 0x2f9   :  { %v350_v19 = vsel %vm349_vm2, %v347_v17, %v344_v16 }
 0x2fa   :  { %v351_v20 = vadd.f32 %v350_v19, %v337_v18 }
 0x2fc   :  { %v918_v21 = vadd.f32 2.0, %v351_v20 }
 0x2fe   :  { %354 = vrot.lane.b32.xlu0 %v918_v21, %s716_s5 }
 0x370   :  { %v355_v22 = vpop.permute.xlu0 %354 }
 0x371   :  { %v357_v23 = vadd.f32 %v355_v22, %v918_v21 }
 0x373   :  { %359 = vrot.lane.b32.xlu0 %v357_v23, %s717_s6 }
 0x3e5   :  { %v360_v24 = vpop.permute.xlu0 %359 }
 0x3e6   :  { %v363_v25 = vsel %vm362_vm3, %v918_v21, %v360_v24 }
 0x3e7   :  { %v438_v26 = vadd.f32 -1.0, %v363_v25 }
 0x3e9   :  { %v365_v27 = vadd.f32 36.0, %v438_v26  ;;  %v384_v28 = vadd.f32 60.458332, %v438_v26  ;;  %v400_v51 = vadd.f32 7.0, %v438_v26  ;;  %v402_v3 = vadd.f32 0.5, %v438_v26 }
 0x3eb   :  { %v366_v29 = vmul.f32 %v438_v26, %v365_v27  ;;  %v385_v30 = vmul.f32 %v438_v26, %v384_v28  ;;  %v401_v54 = vadd.f32 0.5, %v400_v51 }
 0x3ed   :  { %v367_v31 = vadd.f32 546.0, %v366_v29  ;;  %v386_v32 = vadd.f32 1599.0425, %v385_v30 }
 0x3ef   :  { %v368_v33 = vmul.f32 %v438_v26, %v367_v31  ;;  %v387_v34 = vmul.f32 %v438_v26, %v386_v32 }
 0x3f1   :  { %v369_v35 = vadd.f32 4536.0, %v368_v33  ;;  %v388_v36 = vadd.f32 24165.51, %v387_v34 }
 0x3f3   :  { %v370_v37 = vmul.f32 %v438_v26, %v369_v35  ;;  %v389_v38 = vmul.f32 %v438_v26, %v388_v36 }
 0x3f5   :  { %v371_v39 = vadd.f32 22449.0, %v370_v37  ;;  %v390_v40 = vadd.f32 228235.22, %v389_v38 }
 0x3f7   :  { %v372_v41 = vmul.f32 %v438_v26, %v371_v39  ;;  %v391_v43 = vmul.f32 %v438_v26, %v390_v40 }
 0x3f9   :  { %v373_v42 = vadd.f32 67284.0, %v372_v41  ;;  %v392_v46 = vadd.f32 1379496.3, %v391_v43 }
 0x3fb   :  { %v374_v44 = vmul.f32 %v438_v26, %v373_v42  ;;  %v393_v49 = vmul.f32 %v438_v26, %v392_v46 }
 0x3fd   :  { %v375_v45 = vadd.f32 118124.0, %v374_v44  ;;  %v394_v53 = vadd.f32 5210869.0, %v393_v49 }
 0x3ff   :  { %v376_v47 = vmul.f32 %v438_v26, %v375_v45  ;;  %v395_v55 = vmul.f32 %v438_v26, %v394_v53 }
 0x401   :  { %v377_v48 = vadd.f32 109584.0, %v376_v47  ;;  %v396_v56 = vadd.f32 11246929.0, %v395_v55 }
 0x403   :  { %v378_v50 = vmul.f32 %v438_v26, %v377_v48  ;;  %v397_v59 = vmul.f32 %v438_v26, %v396_v56 }
 0x405   :  { %v379_v52 = vadd.f32 40320.0, %v378_v50  ;;  %v398_v63 = vadd.f32 10619610.0, %v397_v59 }
 0x407   :  { %632 = vrcp.f32 %v379_v52 }
 0x408   :  { %634 = vlog2.f32 %v401_v54 }
 0x411   :  { %v633_v57 = vpop.eup %632 }
 0x412   :  { %v381_v58 = vmul.f32 %v633_v57, %v379_v52  ;;  %v635_v61 = vpop.eup %634 }
 0x413   :  { %v404_v2 = vmul.f32 0.6931472, %v635_v61 }
 0x414   :  { %v382_v60 = vsub.f32 2.0, %v381_v58 }
 0x415   :  { %v405_v4 = vmul.f32 %v404_v2, %v402_v3 }
 0x416   :  { %v383_v62 = vmul.f32 %v633_v57, %v382_v60 }
 0x417   :  { %v406_v5 = vadd.f32 0.9189385, %v405_v4 }
 0x418   :  { %v399_v1 = vmul.f32 %v398_v63, %v383_v62 }
 0x419   :  { %v407_v7 = vsub.f32 %v406_v5, %v401_v54 }
 0x41a   :  { %636 = vlog2.f32 %v399_v1 }
 0x424   :  { %v637_v6 = vpop.eup %636 }
 0x425   :  { %v409_v8 = vmul.f32 0.6931472, %v637_v6 }
 0x427   :  { %v410_v9 = vadd.f32 %v409_v8, %v407_v7 }
 0x429   :  { %412 = vrot.lane.b32.xlu1 %v410_v9, %s716_s5 }
 0x42d   :  { %416 = vrot.lane.b32.xlu1 %v410_v9, %s718_s25 }
 0x49b   :  { %v413_v10 = vpop.permute.xlu1 %412 }
 0x49c   :  { %v415_v0 = vadd.f32 %v413_v10, %v410_v9 }
 0x49f   :  { %v417_v11 = vpop.permute.xlu1 %416 }
 0x4a0   :  { %v419_v12 = vsub.f32 %v415_v0, %v417_v11 }
 0x4a2   :  { %421 = vrot.lane.b32.xlu0 %v419_v12, %s717_s6 }
 0x514   :  { %v422_v13 = vpop.permute.xlu0 %421 }
 0x515   :  { %v424_v14 = vsel %vm362_vm3, %v918_v21, %v422_v13 }
 0x516   :  { %v426_v15 = vsel %vm425_vm4, %v424_v14, 0.0 }
 0x517   :  { %427 = vst [vmem:[%s940_s7] sm:$0xff] %v426_v15 }
 0x518   :  { %432 = vsyncpa [#allocation3], 1 }
 0x519   :  { %433 = vsyncpa [#allocation5], 1 }

</bundles_post_ra>
